<compile_context>
chip_gen: v7x
topology: tpu7x:2x2x1
jax: 0.10.0
libtpu: 0.0.40
codegen_flags: <defaults>
</compile_context>

<pallas_src>
import jax
import jax.numpy as jnp
from jax import lax
from jax.experimental import pallas as pl
from jax.experimental.pallas import tpu as pltpu


def _embed_gather_kernel(ids_ref, table_ref, out_ref, buf_ref, sem_ref):
    # ids_ref:   (N_pad,) int32 in SMEM (scalar-prefetched token ids)
    # table_ref: (V, H)   in HBM (memory_space=pl.ANY), gathered via DMA
    # out_ref:   (tn, H)  VMEM output block for this token tile
    # buf_ref:   (tn, H)  VMEM gather scratch
    # sem_ref:   DMA semaphore shared by this tile's row copies
    tn = out_ref.shape[0]
    base = pl.program_id(0) * tn

    # Issue all tn row copies; they are in flight concurrently.
    def issue(t, carry):
        tok = ids_ref[base + t]
        pltpu.make_async_copy(
            table_ref.at[pl.ds(tok, 1), :],
            buf_ref.at[pl.ds(t, 1), :],
            sem_ref,
        ).start()
        return carry

    lax.fori_loop(0, tn, issue, 0)

    # All copies have identical size, so wait once per issued copy.
    def drain(t, carry):
        pltpu.make_async_copy(
            table_ref.at[pl.ds(0, 1), :],
            buf_ref.at[pl.ds(0, 1), :],
            sem_ref,
        ).wait()
        return carry

    lax.fori_loop(0, tn, drain, 0)

    # Lane-dense (tn, H) store into the pipelined output block.
    out_ref[...] = buf_ref[...]


def token_embedding(ids, table, *, tn=256):
    """ids: (B, S) integer tokens; table: (V, H) -> (B, S, H)."""
    B, S = ids.shape
    V, H = table.shape
    N = B * S

    # Clamp ids (jnp.take clamp semantics; protects the DMA gather from OOB).
    ids_flat = jnp.clip(ids.reshape(N).astype(jnp.int32), 0, V - 1)

    # Keep the tile sublane-aligned and avoid massive over-padding for tiny N.
    tn = max(8, min(tn, pl.cdiv(N, 8) * 8))
    n_tiles = pl.cdiv(N, tn)
    n_pad = n_tiles * tn
    if n_pad != N:
        ids_flat = jnp.pad(ids_flat, (0, n_pad - N))  # pad with (valid) id 0

    out_flat = pl.pallas_call(
        _embed_gather_kernel,
        out_shape=jax.ShapeDtypeStruct((n_pad, H), table.dtype),
        grid_spec=pltpu.PrefetchScalarGridSpec(
            num_scalar_prefetch=1,                      # ids -> SMEM
            grid=(n_tiles,),
            in_specs=[pl.BlockSpec(memory_space=pl.ANY)],  # table stays in HBM
            out_specs=pl.BlockSpec((tn, H), lambda i, ids_smem: (i, 0)),
            scratch_shapes=[
                pltpu.VMEM((tn, H), table.dtype),       # gather buffer
                pltpu.SemaphoreType.DMA,                # row-copy semaphore
            ],
        ),
        compiler_params=pltpu.CompilerParams(
            dimension_semantics=("parallel",),          # shards tiles on v7x
            vmem_limit_bytes=32 * 1024 * 1024,          # headroom over v5e 16 MiB default
        ),
    )(ids_flat, table)

    return out_flat[:N].reshape(B, S, H)


if __name__ == "__main__":
    vocab_size = 64
    hidden_size = 128
    B, S = 2, 8

    key = jax.random.PRNGKey(0)
    k_table, k_ids = jax.random.split(key)

    # nn.Embedding default init: weight ~ N(0, 1)
    table = jax.random.normal(k_table, (vocab_size, hidden_size), dtype=jnp.float32)
    ids = jax.random.randint(k_ids, (B, S), 0, vocab_size, dtype=jnp.int32)

    out = jax.block_until_ready(token_embedding(ids, table))

    # Reference: plain JAX gather (same semantics as nn.Embedding forward).
    ref = jnp.take(table, ids, axis=0)
    assert out.shape == (B, S, hidden_size)
    assert out.dtype == jnp.float32
    assert jnp.allclose(out, ref), "mismatch vs reference gather"

    print("KERNEL_OK")
</pallas_src>

<mosaic_0001>
module attributes {stable_mosaic.version = 11 : i64} {
  func.func @_embed_gather_kernel(%arg0: i32, %arg1: memref<16xi32, #tpu.memory_space<smem>>, %arg2: memref<64x128xf32, #tpu.memory_space<any>>, %arg3: memref<16x128xf32, #tpu.memory_space<vmem>>, %arg4: memref<16x128xf32, #tpu.memory_space<vmem>>, %arg5: memref<!tpu.dma_semaphore, #tpu.memory_space<semaphore_mem>>) attributes {dimension_semantics = [#tpu.dimension_semantics<parallel>], iteration_bounds = array<i64: 1>, scalar_prefetch = 1 : i64, scratch_operands = 2 : i64, tpu.core_type = #tpu.core_type<tc>, window_params = [{}, {transform_indices = @transform_1, window_bounds = array<i64: 16, 128>}]} {
    %c16_i32 = arith.constant 16 : i32
    %0 = arith.muli %arg0, %c16_i32 : i32
    %c0_i32 = arith.constant 0 : i32
    %c16_i32_0 = arith.constant 16 : i32
    %1 = arith.addi %c0_i32, %c16_i32_0 : i32
    %c1_i32 = arith.constant 1 : i32
    scf.for %arg6 = %c0_i32 to %1 step %c1_i32  : i32 {
      %5 = arith.addi %0, %arg6 : i32
      %6 = arith.index_cast %5 : i32 to index
      %7 = memref.load %arg1[%6] : memref<16xi32, #tpu.memory_space<smem>>
      %c0_i32_8 = arith.constant 0 : i32
      %8 = tpu.memref_slice %arg2[%7, %c0_i32_8] : memref<64x128xf32, #tpu.memory_space<any>> -> memref<1x128xf32, #tpu.memory_space<any>>
      %c0_i32_9 = arith.constant 0 : i32
      %9 = tpu.memref_slice %arg4[%arg6, %c0_i32_9] : memref<16x128xf32, #tpu.memory_space<vmem>> -> memref<1x128xf32, #tpu.memory_space<vmem>>
      tpu.enqueue_dma source(%8 : memref<1x128xf32, #tpu.memory_space<any>>) target(%9 : memref<1x128xf32, #tpu.memory_space<vmem>>) target_semaphore(%arg5 : memref<!tpu.dma_semaphore, #tpu.memory_space<semaphore_mem>>)
    }
    %c16_i32_1 = arith.constant 16 : i32
    %c0_i32_2 = arith.constant 0 : i32
    %c16_i32_3 = arith.constant 16 : i32
    %2 = arith.addi %c0_i32_2, %c16_i32_3 : i32
    %c1_i32_4 = arith.constant 1 : i32
    scf.for %arg6 = %c0_i32_2 to %2 step %c1_i32_4  : i32 {
      %c0_i32_8 = arith.constant 0 : i32
      %c0_i32_9 = arith.constant 0 : i32
      %5 = tpu.memref_slice %arg2[%c0_i32_8, %c0_i32_9] : memref<64x128xf32, #tpu.memory_space<any>> -> memref<1x128xf32, #tpu.memory_space<any>>
      %c0_i32_10 = arith.constant 0 : i32
      %c0_i32_11 = arith.constant 0 : i32
      %6 = tpu.memref_slice %arg4[%c0_i32_10, %c0_i32_11] : memref<16x128xf32, #tpu.memory_space<vmem>> -> memref<1x128xf32, #tpu.memory_space<vmem>>
      tpu.wait_dma2 semaphore(%arg5 : memref<!tpu.dma_semaphore, #tpu.memory_space<semaphore_mem>>) src(%5 : memref<1x128xf32, #tpu.memory_space<any>>) dst(%6 : memref<1x128xf32, #tpu.memory_space<vmem>>)
    }
    %c0 = arith.constant 0 : index
    %c0_5 = arith.constant 0 : index
    %3 = vector.load %arg4[%c0, %c0_5] : memref<16x128xf32, #tpu.memory_space<vmem>>, vector<16x128xf32>
    %c0_6 = arith.constant 0 : index
    %c0_7 = arith.constant 0 : index
    %4 = vector.load %arg3[%c0_6, %c0_7] : memref<16x128xf32, #tpu.memory_space<vmem>>, vector<16x128xf32>
    tpu.vector_store %arg3[%c0_6, %c0_7], %3 {strides = array<i32>} : memref<16x128xf32, #tpu.memory_space<vmem>>, vector<16x128xf32>,
    return
  }
  func.func @transform_1(%arg0: i32, %arg1: memref<16xi32, #tpu.memory_space<smem>>) -> (i32, i32) {
    %c0_i32 = arith.constant 0 : i32
    %c0_i32_0 = arith.constant 0 : i32
    return %arg0, %c0_i32 : i32, i32
  }
}

</mosaic_0001>

<bundles_post_ra>
// kernel: tpu_custom_call.1
= control target key start
LH: loop header
LB: loop body
LE: loop exit
PB: predicated region body
PF: predicated region fallthrough
CT: control target
= control target key end

     0   :  { %s246_s0 = inlined_call_operand.hbm [shape: s32[16], index: 0, kind: input, shape index: {}]   ;;  %s247_s1 = inlined_call_operand.hbm [shape: f32[64,128], index: 1, kind: input, shape index: {}]   ;;  %s248_s2 = inlined_call_operand.hbm [shape: f32[16,128], index: 2, kind: output, shape index: {}]  }
   0x1   :  { %s105_s11 = scalar_lea.hbm %s246_s0, 16 }
   0x2   :  { %p106_p0 = scmp.ne.s32.totalorder %s246_s0, %s105_s11  ;;  %p109_p1 = scmp.lt.u32.totalorder %s105_s11, %s246_s0 }
   0x4   :  { %p111_p2 = pnand %p109_p1, %p106_p0 }
   0x6   :  { %114 = shalt.err (!%p111_p2)  }
   0x7   :  { %s183_s16 = smov [#allocation5]  }
   0x8   :  { %8 = dma.hbm_to_smem %s246_s0, 16, %s183_s16, [#allocation4] }
   0x9   :  { %169 = dma.done.wait [#allocation4], 16 }
   0xa   :  { %170 = vsyncadd [#allocation4], 4294967280 }
   0xb   :  { %10 = sfence }
   0xc   :  { %11 = vsyncpa [#allocation7], 0  ;;  %s215_s19 = smov 0  }
   0xd LB: > { %s20_s20 = sld [smem:[#allocation5 + %s177_s19]]  ;;  %s23_s21 = scalar_lea.vmem [#allocation2], %s177_s19  ;;  %s177_s19 = sphi %s215_s19, %s18_s19  }
   0xe   : > { %s31_s22 = sshll.u32 %s23_s21, 4  ;;  %s117_s29 = scalar_lea.hbm %s247_s1, 1024  ;;  %s32_s22 = int_to_ptr.vmem [resolvable:$true] %s31_s22 }
  0x13   : > { %s83_s23 = sshll.u32 %s20_s20, 4 }
  0x14   : > { %s22_s25 = scalar_lea.hbm %s247_s1, %s83_s23 }
  0x15   : > { %s115_s26 = scalar_lea.hbm %s22_s25, 16  ;;  %p118_p4 = scmp.lt.u32.totalorder %s22_s25, %s247_s1 }
  0x16   : > { %p116_p3 = scmp.ne.s32.totalorder %s22_s25, %s115_s26  ;;  %p119_p5 = scmp.lt.u32.totalorder %s117_s29, %s115_s26 }
  0x17   : > { %p121_p7 = scmp.lt.u32.totalorder %s115_s26, %s22_s25 }
  0x18   : > { %p120_p6 = por %p119_p5, %p118_p4 }
  0x1a   : > { %p122_p8 = por %p121_p7, %p120_p6 }
  0x1c   : > { %p123_p9 = pnand %p122_p8, %p116_p3 }
  0x1e   : > { %126 = shalt.err (!%p123_p9)  }
  0x1f   : > { %s127_s4 = scalar_lea.vmem %s32_s22, 16  ;;  %s184_s5 = smov [#allocation2]  }
  0x20   : > { %p128_p10 = scmp.ne.s32.totalorder %s32_s22, %s127_s4  ;;  %s129_s6 = sshll.u32 %s184_s5, 4  ;;  %s130_s6 = int_to_ptr.vmem [resolvable:$false] %s129_s6 }
  0x21   : > { %s131_s7 = scalar_lea.vmem %s130_s6, 256  ;;  %p132_p11 = scmp.lt.s32.totalorder %s32_s22, %s130_s6 }
  0x22   : > { %p133_p12 = scmp.lt.s32.totalorder %s131_s7, %s127_s4 }
  0x24   : > { %p134_p13 = por %p133_p12, %p132_p11 }
  0x26   : > { %p135_p0 = pnand %p134_p13, %p128_p10 }
  0x28   : > { %138 = shalt.err (!%p135_p0)  }
  0x29   : > { %34 = dma.hbm_to_vmem [thread:$0]  %s22_s25, 16, %s32_s22, [#allocation3] }
  0x2a   : > { %s18_s19 = sadd.s32 1, %s177_s19  }
  0x2b   : > { %p15_p1 = scmp.ge.s32.totalorder %s18_s19, 16  }
  0x2c   :  { %s179_s8 = smov (%p15_p1), 0  }
  0x2d   :  { %17 = sbr.rel (!%p15_p1) target bundleno = 13 (0xd), region = 40 }
  0x34 LB: > { %171 = dma.done.wait [#allocation3], 16  ;;  %s181_s8 = sphi %s179_s8, %s40_s8  }
  0x35   : > { %172 = vsyncadd [#allocation3], 4294967280  ;;  %s40_s8 = sadd.s32 1, %s181_s8  }
  0x36   : > { %p37_p2 = scmp.ge.s32.totalorder %s40_s8, 16  }
  0x37   :  { %v44_v0 = vld [vmem:[#allocation2] sm:$0xff] (%p37_p2)  ;;  %v45_v1 = vld [vmem:[#allocation2 + $0x8] sm:$0xff] (%p37_p2)  ;;  %s185_s9 = smov (%p37_p2), [#allocation6]  }
  0x38   :  { %39 = sbr.rel (!%p37_p2) target bundleno = 52 (0x34), region = 51  ;;  %46 = vst [vmem:[#allocation6] sm:$0xff] (%p37_p2), %v44_v0  ;;  %47 = vst [vmem:[#allocation6 + $0x8] sm:$0xff] (%p37_p2), %v45_v1  ;;  %s53_s10 = sshll.u32 (%p37_p2), %s185_s9, 4  ;;  %s54_s10 = int_to_ptr.vmem [resolvable:$true] %s53_s10 }
  0x39   :  { %s139_s11 = scalar_lea.vmem (%p37_p2), %s54_s10, 256  ;;  %p144_p4 = scmp.lt.s32.totalorder (%p37_p2), %s54_s10, %s54_s10 }
  0x3a   :  { %p140_p3 = scmp.ne.s32.totalorder (%p37_p2), %s54_s10, %s139_s11  ;;  %p145_p5 = scmp.lt.s32.totalorder (%p37_p2), %s139_s11, %s139_s11 }
  0x3c   :  { %p146_p6 = por (%p37_p2), %p145_p5, %p144_p4 }
  0x3e   :  { %p147_p7 = pnand (%p37_p2), %p146_p6, %p140_p3 }
  0x40   :  { %150 = shalt.err (!%p147_p7)
}
  0x41   :  { %s151_s13 = scalar_lea.hbm %s248_s2, 256 }
  0x42   :  { %p152_p8 = scmp.ne.s32.totalorder %s248_s2, %s151_s13  ;;  %p155_p9 = scmp.lt.u32.totalorder %s151_s13, %s248_s2 }
  0x44   :  { %p157_p10 = pnand %p155_p9, %p152_p8 }
  0x46   :  { %160 = shalt.err (!%p157_p10)
}
  0x47   :  { %s186_s18 = smov 128   ;;  %s187_s19 = smov 8  }
  0x48   :  { %59 = dma.vmem_to_hbm [thread:$0]  %s54_s10, 256, %s248_s2, [#allocation7], %s186_s18, %s186_s18, %s187_s19  }
  0x49   :  { %173 = dma.done.wait [#allocation7], 256  }
  0x4a   :  { %174 = vsyncadd [#allocation7], 4294967040 }
  0x4b   :  { %63 = vsyncpa [#allocation7], 1 }
  0x4c   :  { %64 = vsyncmov [#allocation3] }
  0x4f   :  { %s65_s22 = vpop.sfrf %64 }
  0x50   :  { %p84_p11 = scmp.ne.s32.totalorder %s65_s22, 0 }
  0x52   :  { %69 = shalt.err (%p84_p11)  }

</bundles_post_ra>
